<compile_context>
chip_gen: v6e
topology: v6e:2x2x1
jax: 0.10.0
libtpu: 0.0.40
codegen_flags: <defaults>
</compile_context>

<pallas_src>
import math
import functools

import jax
import jax.numpy as jnp
from jax import lax
from jax.experimental import pallas as pl
from jax.experimental.pallas import tpu as pltpu


# ---------------------------------------------------------------------------
# Per-chip VMEM policy + optional single-buffering of constant weight blocks
# ---------------------------------------------------------------------------
_VMEM_LIMITS_CACHE = None
_SINGLE_BUFFER_KW = None


def _chip_vmem_limits():
    """Return (default_scoped_bytes, usable_cap_bytes) for the local chip."""
    global _VMEM_LIMITS_CACHE
    if _VMEM_LIMITS_CACHE is not None:
        return _VMEM_LIMITS_CACHE
    phys = 128 << 20
    try:
        phys = int(getattr(pltpu.get_tpu_info(), "vmem_capacity_bytes", phys))
    except Exception:
        pass
    kind = ""
    try:
        kind = jax.devices()[0].device_kind.lower()
    except Exception:
        pass
    # Default scoped VMEM: 16 MiB on v5e, 32 MiB on v6e/v7x (conservative if unknown).
    default_scoped = (16 << 20) if ("v5" in kind) else (32 << 20)
    # Cap: physical minus headroom, never above ~100 MiB (=> <= ~56 MiB on v7x).
    cap = max(min(phys - (8 << 20), 100 << 20), 16 << 20)
    _VMEM_LIMITS_CACHE = (default_scoped, cap)
    return _VMEM_LIMITS_CACHE


def _compiler_params(dimension_semantics, need_bytes):
    """CompilerParams; raise the scoped VMEM limit only when actually needed."""
    kwargs = {"dimension_semantics": dimension_semantics}
    default_scoped, cap = _chip_vmem_limits()
    need_bytes = int(need_bytes)
    if need_bytes > default_scoped:
        kwargs["vmem_limit_bytes"] = int(min(max(int(need_bytes * 1.25), default_scoped), cap))
    return pltpu.CompilerParams(**kwargs)


def _probe_kernel(x_ref, o_ref):
    o_ref[...] = x_ref[...] * 2.0


def _weight_spec_kwargs():
    """{'pipeline_mode': pl.Buffered(1)} if single-buffering is supported, else {}.

    Constant-index weight/bias blocks don't need double buffering; halving them
    frees VMEM for larger row tiles (matters most on v7x's 64 MiB VMEM).
    """
    global _SINGLE_BUFFER_KW
    if _SINGLE_BUFFER_KW is None:
        try:
            spec = pl.BlockSpec((8, 128), lambda i: (0, 0), pipeline_mode=pl.Buffered(1))
            out = pl.pallas_call(
                _probe_kernel,
                out_shape=jax.ShapeDtypeStruct((8, 128), jnp.float32),
                grid=(2,),
                in_specs=[spec],
                out_specs=pl.BlockSpec((8, 128), lambda i: (0, 0)),
            )(jnp.ones((8, 128), jnp.float32))
            jax.block_until_ready(out)
            _SINGLE_BUFFER_KW = {"pipeline_mode": pl.Buffered(1)}
        except Exception:
            _SINGLE_BUFFER_KW = {}
    return _SINGLE_BUFFER_KW


# ---------------------------------------------------------------------------
# Projection kernels
# ---------------------------------------------------------------------------
def _qkv_proj_kernel(xq_ref, xk_ref, xv_ref, w_ref, b_ref, q_ref, k_ref, v_ref):
    """Cross-attention: three projections in one launch.

    xq/xk/xv: (TM, Din); w: (3, Din, Dout); b: (3, 1, Dout); q/k/v out: (TM, Dout).
    """
    q_ref[...] = (jnp.dot(xq_ref[...], w_ref[0], preferred_element_type=jnp.float32)
                  + b_ref[0]).astype(q_ref.dtype)
    k_ref[...] = (jnp.dot(xk_ref[...], w_ref[1], preferred_element_type=jnp.float32)
                  + b_ref[1]).astype(k_ref.dtype)
    v_ref[...] = (jnp.dot(xv_ref[...], w_ref[2], preferred_element_type=jnp.float32)
                  + b_ref[2]).astype(v_ref.dtype)


def _qkv_fused_kernel(x_ref, w_ref, b_ref, q_ref, k_ref, v_ref, *, d_out):
    """Self-attention fast path: one (TM, Din) @ (Din, 3*Dout) matmul + bias."""
    y = jnp.dot(x_ref[...], w_ref[...], preferred_element_type=jnp.float32) + b_ref[...]
    q_ref[...] = y[:, :d_out].astype(q_ref.dtype)
    k_ref[...] = y[:, d_out:2 * d_out].astype(k_ref.dtype)
    v_ref[...] = y[:, 2 * d_out:].astype(v_ref.dtype)


def pallas_qkv_projection(xq, xk, xv, w_qkv, b_qkv, *, tm=512):
    """xq/xk/xv: (B, S, Din); w_qkv: (3, Din, Dout); b_qkv: (3, Dout)."""
    B, S, Din = xq.shape
    Dout = w_qkv.shape[-1]
    M = B * S
    tm = min(tm, M)
    isz = xq.dtype.itemsize
    wsz = w_qkv.dtype.itemsize
    wkw = _weight_spec_kwargs()
    wbuf = 1 if wkw else 2

    need = (3 * tm * Din * isz * 2            # x blocks (double-buffered)
            + 3 * Din * Dout * wsz * wbuf     # stacked weights
            + 3 * Dout * wsz * wbuf           # biases
            + 3 * tm * Dout * isz * 2         # output blocks
            + 3 * tm * Dout * 4)              # f32 matmul results before cast

    q, k, v = pl.pallas_call(
        _qkv_proj_kernel,
        out_shape=tuple(jax.ShapeDtypeStruct((M, Dout), xq.dtype) for _ in range(3)),
        grid=(pl.cdiv(M, tm),),
        in_specs=[
            pl.BlockSpec((tm, Din), lambda i: (i, 0)),
            pl.BlockSpec((tm, Din), lambda i: (i, 0)),
            pl.BlockSpec((tm, Din), lambda i: (i, 0)),
            pl.BlockSpec((3, Din, Dout), lambda i: (0, 0, 0), **wkw),
            pl.BlockSpec((3, 1, Dout), lambda i: (0, 0, 0), **wkw),
        ],
        out_specs=tuple(pl.BlockSpec((tm, Dout), lambda i: (i, 0)) for _ in range(3)),
        compiler_params=_compiler_params(("parallel",), need),
    )(xq.reshape(M, Din), xk.reshape(M, Din), xv.reshape(M, Din),
      w_qkv, b_qkv.reshape(3, 1, Dout))
    return (q.reshape(B, S, Dout), k.reshape(B, S, Dout), v.reshape(B, S, Dout))


def pallas_qkv_projection_self(x, w_qkv, b_qkv, *, tm=512):
    """query is key is value: one LHS DMA + one 3*Dout-wide MXU output tile."""
    B, S, Din = x.shape
    Dout = w_qkv.shape[-1]
    M = B * S
    tm = min(tm, M)
    isz = x.dtype.itemsize
    wsz = w_qkv.dtype.itemsize
    wkw = _weight_spec_kwargs()
    wbuf = 1 if wkw else 2

    # (3, Din, Dout) -> (Din, 3*Dout): concatenation of Wq|Wk|Wv along out lanes.
    w_fused = jnp.transpose(w_qkv, (1, 0, 2)).reshape(Din, 3 * Dout)
    b_fused = b_qkv.reshape(1, 3 * Dout)

    need = (tm * Din * isz * 2
            + Din * 3 * Dout * wsz * wbuf
            + 3 * Dout * wsz * wbuf
            + 3 * tm * Dout * isz * 2
            + tm * 3 * Dout * 4)

    kernel = functools.partial(_qkv_fused_kernel, d_out=Dout)
    q, k, v = pl.pallas_call(
        kernel,
        out_shape=tuple(jax.ShapeDtypeStruct((M, Dout), x.dtype) for _ in range(3)),
        grid=(pl.cdiv(M, tm),),
        in_specs=[
            pl.BlockSpec((tm, Din), lambda i: (i, 0)),
            pl.BlockSpec((Din, 3 * Dout), lambda i: (0, 0), **wkw),
            pl.BlockSpec((1, 3 * Dout), lambda i: (0, 0), **wkw),
        ],
        out_specs=tuple(pl.BlockSpec((tm, Dout), lambda i: (i, 0)) for _ in range(3)),
        compiler_params=_compiler_params(("parallel",), need),
    )(x.reshape(M, Din), w_fused, b_fused)
    return (q.reshape(B, S, Dout), k.reshape(B, S, Dout), v.reshape(B, S, Dout))


# ---------------------------------------------------------------------------
# Attention kernel — grid (B, H), one head per step
# ---------------------------------------------------------------------------
def _make_attention_kernel(scale, has_mask, return_prob):
    def kernel(*refs):
        if has_mask:
            q_ref, k_ref, v_ref, m_ref = refs[:4]
            out_refs = refs[4:]
        else:
            q_ref, k_ref, v_ref = refs[:3]
            m_ref = None
            out_refs = refs[3:]
        if return_prob:
            o_ref, p_ref = out_refs
        else:
            (o_ref,) = out_refs
            p_ref = None

        # Module's swapped-role semantics:
        #   V_proj drives the scores, Q_proj multiplies the probabilities.
        q = q_ref[0, 0]          # (S, depth)  Q_proj head
        k = k_ref[0, 0]          # (S, depth)  K_proj head
        v = v_ref[0, 0]          # (S, depth)  V_proj head

        # scores = V_proj @ K_proj^T / sqrt(d_k); contract on last dim (no k.T).
        s = lax.dot_general(v, k, dimension_numbers=(((1,), (1,)), ((), ())),
                            preferred_element_type=jnp.float32) * scale
        if m_ref is not None:
            # PyTorch quirk preserved: masked positions get the VALUE 1e-9 (not -inf).
            s = jnp.where(m_ref[0] == 0, jnp.float32(1e-9), s)

        s = s - jnp.max(s, axis=-1, keepdims=True)
        e = jnp.exp(s)
        denom = jnp.sum(e, axis=-1, keepdims=True)

        if p_ref is not None:
            prob = e / denom                               # exact: user-visible output
            p_ref[0, 0] = prob.astype(p_ref.dtype)
            o = jnp.dot(prob.astype(q.dtype), q, preferred_element_type=jnp.float32)
        else:
            # prob not returned: defer normalization past the PV matmul
            # (S*depth multiplies instead of S*S) using the approx EUP reciprocal.
            o = jnp.dot(e.astype(q.dtype), q, preferred_element_type=jnp.float32)
            o = o * pl.reciprocal(denom, approx=True)
        o_ref[0, 0] = o.astype(o_ref.dtype)

    return kernel


def pallas_attention(qh, kh, vh, mask=None, return_prob=True):
    """qh/kh/vh: (B, H, S, depth).  Returns (attn (B,H,S,depth), prob or None)."""
    B, H, S, depth = qh.shape
    scale = 1.0 / math.sqrt(depth)
    isz = qh.dtype.itemsize

    # Per-grid-step VMEM estimate: double-buffered I/O blocks + f32 temporaries.
    need = 3 * S * depth * isz * 2            # q/k/v blocks
    need += S * depth * isz * 2               # output block
    need += 3 * S * S * 4 + S * depth * 4     # f32 score / exp / prob + PV result
    if return_prob:
        need += S * S * isz * 2               # prob block
    if mask is not None:
        need += S * S * mask.dtype.itemsize * 2

    qkv_spec = pl.BlockSpec((1, 1, S, depth), lambda b, h: (b, h, 0, 0))
    in_specs = [qkv_spec, qkv_spec, qkv_spec]
    operands = [qh, kh, vh]
    if mask is not None:
        in_specs.append(pl.BlockSpec((1, S, S), lambda b, h: (b, 0, 0)))
        operands.append(mask)

    if return_prob:
        out_shape = (jax.ShapeDtypeStruct((B, H, S, depth), qh.dtype),
                     jax.ShapeDtypeStruct((B, H, S, S), qh.dtype))
        out_specs = (pl.BlockSpec((1, 1, S, depth), lambda b, h: (b, h, 0, 0)),
                     pl.BlockSpec((1, 1, S, S), lambda b, h: (b, h, 0, 0)))
    else:
        out_shape = jax.ShapeDtypeStruct((B, H, S, depth), qh.dtype)
        out_specs = pl.BlockSpec((1, 1, S, depth), lambda b, h: (b, h, 0, 0))

    kernel = _make_attention_kernel(scale, mask is not None, return_prob)
    res = pl.pallas_call(
        kernel,
        out_shape=out_shape,
        grid=(B, H),
        in_specs=in_specs,
        out_specs=out_specs,
        compiler_params=_compiler_params(("parallel", "parallel"), need),
    )(*operands)

    if return_prob:
        attn, prob = res
        return attn, prob
    return res, None


# ---------------------------------------------------------------------------
# Head-merge fused into the output projection — grid (B, H), H is a reduction
# ---------------------------------------------------------------------------
def _fc_merge_kernel(a_ref, w_ref, b_ref, o_ref, acc_ref):
    h = pl.program_id(1)

    @pl.when(h == 0)
    def _():
        acc_ref[...] = jnp.zeros_like(acc_ref)

    acc_ref[...] += jnp.dot(a_ref[0, 0], w_ref[0], preferred_element_type=jnp.float32)

    @pl.when(h == pl.num_programs(1) - 1)
    def _():
        o_ref[0] = (acc_ref[...] + b_ref[...]).astype(o_ref.dtype)


def pallas_fc_merge(attn, w, b):
    """out = concat_heads(attn) @ w + b, without materializing the concat.

    attn: (B, H, S, depth); w: (d_model, d_model) stored (in, out); b: (d_model,).
    """
    B, H, S, depth = attn.shape
    Dm = w.shape[1]
    isz = attn.dtype.itemsize
    wsz = w.dtype.itemsize
    wkw = _weight_spec_kwargs()
    w_r = w.reshape(H, depth, Dm)     # rows h*depth+d -> [h, d, :]

    need = (S * depth * isz * 2       # attn block
            + depth * Dm * wsz * 2    # weight slice (cycles with h)
            + Dm * wsz * 2            # bias
            + S * Dm * 4              # f32 accumulator scratch
            + S * Dm * isz * 2)       # output block

    out = pl.pallas_call(
        _fc_merge_kernel,
        out_shape=jax.ShapeDtypeStruct((B, S, Dm), attn.dtype),
        grid=(B, H),
        in_specs=[
            pl.BlockSpec((1, 1, S, depth), lambda b, h: (b, h, 0, 0)),
            pl.BlockSpec((1, depth, Dm), lambda b, h: (h, 0, 0)),
            pl.BlockSpec((1, Dm), lambda b, h: (0, 0), **wkw),
        ],
        out_specs=pl.BlockSpec((1, S, Dm), lambda b, h: (b, 0, 0)),
        scratch_shapes=[pltpu.VMEM((S, Dm), jnp.float32)],
        compiler_params=_compiler_params(("parallel", "arbitrary"), need),
    )(attn, w_r, b.reshape(1, Dm))
    return out


# ---------------------------------------------------------------------------
# MultiHeadAttention forward (glue in plain JAX, hot path in Pallas)
# ---------------------------------------------------------------------------
def _split_heads(x, num_heads):
    """(B, S, D) -> (B, H, S, depth).  Small XLA relayout; keeps Pallas blocks aligned."""
    B, S, D = x.shape
    return x.reshape(B, S, num_heads, D // num_heads).transpose(0, 2, 1, 3)


def _attention_and_out(q, k, v, params, mask, num_heads, return_prob):
    qh = _split_heads(q, num_heads)
    kh = _split_heads(k, num_heads)
    vh = _split_heads(v, num_heads)
    attn, prob = pallas_attention(qh, kh, vh, mask=mask, return_prob=return_prob)
    out = pallas_fc_merge(attn, params["fc_w"], params["fc_b"])
    return out, prob


@functools.partial(jax.jit, static_argnames=("num_heads", "return_prob"))
def _mha_forward_cross(query, key, value, params, mask, num_heads, return_prob):
    q, k, v = pallas_qkv_projection(query, key, value,
                                    params["wqkv_w"], params["wqkv_b"])
    return _attention_and_out(q, k, v, params, mask, num_heads, return_prob)


@functools.partial(jax.jit, static_argnames=("num_heads", "return_prob"))
def _mha_forward_self(x, params, mask, num_heads, return_prob):
    q, k, v = pallas_qkv_projection_self(x, params["wqkv_w"], params["wqkv_b"])
    return _attention_and_out(q, k, v, params, mask, num_heads, return_prob)


def mha_forward(query, key, value, params, num_heads, mask=None, return_prob=True):
    """MultiHeadAttention.forward -> (out, attention_prob or None)."""
    if (query is key) and (key is value):
        return _mha_forward_self(query, params, mask,
                                 num_heads=num_heads, return_prob=return_prob)
    return _mha_forward_cross(query, key, value, params, mask,
                              num_heads=num_heads, return_prob=return_prob)


def make_params(key, d_model, d_embed):
    """Deterministic init. Weights stored as (in, out) = W^T of torch; QKV stacked."""
    ks = jax.random.split(key, 4)
    s_in = 1.0 / math.sqrt(d_embed)
    s_md = 1.0 / math.sqrt(d_model)
    return {
        "wqkv_w": jax.random.uniform(ks[0], (3, d_embed, d_model), jnp.float32, -s_in, s_in),
        "wqkv_b": jax.random.uniform(ks[1], (3, d_model), jnp.float32, -s_in, s_in),
        "fc_w": jax.random.uniform(ks[2], (d_model, d_model), jnp.float32, -s_md, s_md),
        "fc_b": jax.random.uniform(ks[3], (d_model,), jnp.float32, -s_md, s_md),
    }


def mha_reference(query, key, value, params, num_heads, mask=None):
    """Pure-JAX reference replicating the PyTorch forward exactly."""
    B = query.shape[0]
    d_model = params["wqkv_w"].shape[-1]
    q = query @ params["wqkv_w"][0] + params["wqkv_b"][0]
    k = key @ params["wqkv_w"][1] + params["wqkv_b"][1]
    v = value @ params["wqkv_w"][2] + params["wqkv_b"][2]

    def split(x):
        b, s, _ = x.shape
        return x.reshape(b, s, num_heads, -1).transpose(0, 2, 1, 3)

    qh, kh, vh = split(q), split(k), split(v)
    d_k = kh.shape[-1]
    # calculate_attention(query=qh, key=kh, value=vh) with signature (value, key, query):
    score = jnp.einsum("bhsd,bhtd->bhst", vh, kh) / math.sqrt(d_k)
    if mask is not None:
        score = jnp.where(mask[:, None] == 0, 1e-9, score)
    prob = jax.nn.softmax(score, axis=-1)
    attn = jnp.einsum("bhst,bhtd->bhsd", prob, qh)
    out = attn.transpose(0, 2, 1, 3).reshape(B, -1, d_model)
    out = out @ params["fc_w"] + params["fc_b"]
    return out, prob


if __name__ == "__main__":
    # Small deterministic shapes; d_model=128 keeps output tiles lane-dense
    # (4 heads, depth=32).
    batch, seq, d_embed, d_model, num_heads = 2, 8, 64, 128, 4

    root = jax.random.PRNGKey(0)
    k_params, k_q, k_k, k_v, k_m = jax.random.split(root, 5)
    params = make_params(k_params, d_model, d_embed)

    query = jax.random.normal(k_q, (batch, seq, d_embed), jnp.float32)
    key = jax.random.normal(k_k, (batch, seq, d_embed), jnp.float32)
    value = jax.random.normal(k_v, (batch, seq, d_embed), jnp.float32)

    # Probe once whether single-buffered constant weight blocks are supported.
    _weight_spec_kwargs()

    def _max_diff(a, b):
        return float(jnp.max(jnp.abs(a - b)))

    # 1) Cross-attention, mask=None (the module's default path).
    out, prob = mha_forward(query, key, value, params, num_heads=num_heads)
    out, prob = jax.block_until_ready((out, prob))
    ref_out, ref_prob = mha_reference(query, key, value, params, num_heads)
    assert out.shape == (batch, seq, d_model)
    assert prob.shape == (batch, num_heads, seq, seq)
    assert jnp.allclose(out, ref_out, atol=5e-3, rtol=5e-3), _max_diff(out, ref_out)
    assert jnp.allclose(prob, ref_prob, atol=5e-3, rtol=5e-3), _max_diff(prob, ref_prob)

    # 2) Masked cross-attention (masked_fill(mask==0, 1e-9) quirk preserved).
    mask = (jax.random.uniform(k_m, (batch, seq, seq)) > 0.3).astype(jnp.float32)
    out_m, prob_m = mha_forward(query, key, value, params, num_heads=num_heads, mask=mask)
    out_m, prob_m = jax.block_until_ready((out_m, prob_m))
    ref_out_m, ref_prob_m = mha_reference(query, key, value, params, num_heads, mask=mask)
    assert jnp.allclose(out_m, ref_out_m, atol=5e-3, rtol=5e-3), _max_diff(out_m, ref_out_m)
    assert jnp.allclose(prob_m, ref_prob_m, atol=5e-3, rtol=5e-3), _max_diff(prob_m, ref_prob_m)

    # 3) Self-attention fast path (fused (Din, 3*d_model) projection).
    out_s, prob_s = mha_forward(query, query, query, params, num_heads=num_heads)
    out_s, prob_s = jax.block_until_ready((out_s, prob_s))
    ref_out_s, ref_prob_s = mha_reference(query, query, query, params, num_heads)
    assert jnp.allclose(out_s, ref_out_s, atol=5e-3, rtol=5e-3), _max_diff(out_s, ref_out_s)
    assert jnp.allclose(prob_s, ref_prob_s, atol=5e-3, rtol=5e-3), _max_diff(prob_s, ref_prob_s)

    # 4) prob output gated (deferred approx-reciprocal normalization).
    out_np, prob_none = mha_forward(query, key, value, params, num_heads=num_heads,
                                    return_prob=False)
    out_np = jax.block_until_ready(out_np)
    assert prob_none is None
    assert jnp.allclose(out_np, ref_out, atol=5e-3, rtol=5e-3), _max_diff(out_np, ref_out)

    print("KERNEL_OK")
</pallas_src>

<mosaic_0001>
module attributes {stable_mosaic.version = 11 : i64} {
  func.func @_probe_kernel(%arg0: i32, %arg1: memref<8x128xf32, #tpu.memory_space<vmem>>, %arg2: memref<8x128xf32, #tpu.memory_space<vmem>>) attributes {dimension_semantics = [#tpu.dimension_semantics<arbitrary>], iteration_bounds = array<i64: 2>, scalar_prefetch = 0 : i64, scratch_operands = 0 : i64, tpu.core_type = #tpu.core_type<tc>, window_params = [{pipeline_mode = #tpu.pipeline_mode<synchronous>, transform_indices = @transform_0, window_bounds = array<i64: 8, 128>}, {pipeline_mode = #tpu.pipeline_mode<synchronous>, transform_indices = @transform_1, window_bounds = array<i64: 8, 128>}]} {
    %c0 = arith.constant 0 : index
    %c0_0 = arith.constant 0 : index
    %0 = vector.load %arg1[%c0, %c0_0] : memref<8x128xf32, #tpu.memory_space<vmem>>, vector<8x128xf32>
    %cst = arith.constant 2.000000e+00 : f32
    %1 = vector.broadcast %cst : f32 to vector<8x128xf32>
    %2 = arith.mulf %0, %1 : vector<8x128xf32>
    %c0_1 = arith.constant 0 : index
    %c0_2 = arith.constant 0 : index
    %3 = vector.load %arg2[%c0_1, %c0_2] : memref<8x128xf32, #tpu.memory_space<vmem>>, vector<8x128xf32>
    tpu.vector_store %arg2[%c0_1, %c0_2], %2 {strides = array<i32>} : memref<8x128xf32, #tpu.memory_space<vmem>>, vector<8x128xf32>,
    return
  }
  func.func @transform_0(%arg0: i32) -> (i32, i32) {
    %c0_i32 = arith.constant 0 : i32
    %c0_i32_0 = arith.constant 0 : i32
    %c0_i32_1 = arith.constant 0 : i32
    return %c0_i32, %c0_i32_0 : i32, i32
  }
  func.func @transform_1(%arg0: i32) -> (i32, i32) {
    %c0_i32 = arith.constant 0 : i32
    %c0_i32_0 = arith.constant 0 : i32
    %c0_i32_1 = arith.constant 0 : i32
    return %c0_i32, %c0_i32_0 : i32, i32
  }
}

module attributes {stable_mosaic.version = 11 : i64} {
  func.func @kernel(%arg0: i32, %arg1: i32, %arg2: memref<1x1x8x32xf32, #tpu.memory_space<vmem>>, %arg3: memref<1x1x8x32xf32, #tpu.memory_space<vmem>>, %arg4: memref<1x1x8x32xf32, #tpu.memory_space<vmem>>, %arg5: memref<1x1x8x32xf32, #tpu.memory_space<vmem>>, %arg6: memref<1x1x8x8xf32, #tpu.memory_space<vmem>>) attributes {dimension_semantics = [#tpu.dimension_semantics<parallel>, #tpu.dimension_semantics<parallel>], iteration_bounds = array<i64: 2, 4>, scalar_prefetch = 0 : i64, scratch_operands = 0 : i64, tpu.core_type = #tpu.core_type<tc>, window_params = [{transform_indices = @transform_0, window_bounds = array<i64: 1, 1, 8, 32>}, {transform_indices = @transform_1, window_bounds = array<i64: 1, 1, 8, 32>}, {transform_indices = @transform_2, window_bounds = array<i64: 1, 1, 8, 32>}, {transform_indices = @transform_3, window_bounds = array<i64: 1, 1, 8, 32>}, {transform_indices = @transform_4, window_bounds = array<i64: 1, 1, 8, 8>}]} {
    %c0 = arith.constant 0 : index
    %c0_0 = arith.constant 0 : index
    %c0_1 = arith.constant 0 : index
    %c0_2 = arith.constant 0 : index
    %0 = vector.load %arg2[%c0, %c0_0, %c0_1, %c0_2] : memref<1x1x8x32xf32, #tpu.memory_space<vmem>>, vector<1x1x8x32xf32>
    %1 = vector.shape_cast %0 : vector<1x1x8x32xf32> to vector<8x32xf32>
    %c0_3 = arith.constant 0 : index
    %c0_4 = arith.constant 0 : index
    %c0_5 = arith.constant 0 : index
    %c0_6 = arith.constant 0 : index
    %2 = vector.load %arg3[%c0_3, %c0_4, %c0_5, %c0_6] : memref<1x1x8x32xf32, #tpu.memory_space<vmem>>, vector<1x1x8x32xf32>
    %3 = vector.shape_cast %2 : vector<1x1x8x32xf32> to vector<8x32xf32>
    %c0_7 = arith.constant 0 : index
    %c0_8 = arith.constant 0 : index
    %c0_9 = arith.constant 0 : index
    %c0_10 = arith.constant 0 : index
    %4 = vector.load %arg4[%c0_7, %c0_8, %c0_9, %c0_10] : memref<1x1x8x32xf32, #tpu.memory_space<vmem>>, vector<1x1x8x32xf32>
    %5 = vector.shape_cast %4 : vector<1x1x8x32xf32> to vector<8x32xf32>
    %cst = arith.constant dense<0.000000e+00> : vector<8x8xf32>
    %6 = tpu.matmul %5, %3, %cst {dimension_numbers = #tpu.dot_dimension_numbers<[1], [1], [0], [0], [0, 0, 1, 0], [], []>} : vector<8x32xf32>, vector<8x32xf32>, vector<8x8xf32> -> vector<8x8xf32>
    %cst_11 = arith.constant 0.176776692 : f32
    %7 = vector.broadcast %cst_11 : f32 to vector<8x8xf32>
    %8 = arith.mulf %6, %7 : vector<8x8xf32>
    %cst_12 = arith.constant dense<0xFF800000> : vector<8xf32>
    %9 = vector.multi_reduction <maximumf>, %8, %cst_12 [1] : vector<8x8xf32> to vector<8xf32>
    %10 = vector.shape_cast %9 : vector<8xf32> to vector<8x1xf32>
    %11 = vector.broadcast %10 : vector<8x1xf32> to vector<8x8xf32>
    %12 = arith.subf %8, %11 : vector<8x8xf32>
    %13 = math.exp %12 : vector<8x8xf32>
    %cst_13 = arith.constant dense<0.000000e+00> : vector<8xf32>
    %14 = vector.multi_reduction <add>, %13, %cst_13 [1] : vector<8x8xf32> to vector<8xf32>
    %15 = vector.shape_cast %14 : vector<8xf32> to vector<8x1xf32>
    %16 = vector.broadcast %15 : vector<8x1xf32> to vector<8x8xf32>
    %17 = arith.divf %13, %16 : vector<8x8xf32>
    %c0_14 = arith.constant 0 : index
    %c0_15 = arith.constant 0 : index
    %c0_16 = arith.constant 0 : index
    %c0_17 = arith.constant 0 : index
    %18 = vector.load %arg6[%c0_14, %c0_15, %c0_16, %c0_17] : memref<1x1x8x8xf32, #tpu.memory_space<vmem>>, vector<1x1x8x8xf32>
    %19 = vector.shape_cast %18 : vector<1x1x8x8xf32> to vector<8x8xf32>
    %20 = vector.shape_cast %17 : vector<8x8xf32> to vector<1x1x8x8xf32>
    tpu.vector_store %arg6[%c0_14, %c0_15, %c0_16, %c0_17], %20 {strides = array<i32>} : memref<1x1x8x8xf32, #tpu.memory_space<vmem>>, vector<1x1x8x8xf32>,
    %cst_18 = arith.constant dense<0.000000e+00> : vector<8x32xf32>
    %21 = tpu.matmul %17, %1, %cst_18 {dimension_numbers = #tpu.dot_dimension_numbers<[1], [0], [0], [1], [0, 0, 1, 1], [], []>} : vector<8x8xf32>, vector<8x32xf32>, vector<8x32xf32> -> vector<8x32xf32>
    %c0_19 = arith.constant 0 : index
    %c0_20 = arith.constant 0 : index
    %c0_21 = arith.constant 0 : index
    %c0_22 = arith.constant 0 : index
    %22 = vector.load %arg5[%c0_19, %c0_20, %c0_21, %c0_22] : memref<1x1x8x32xf32, #tpu.memory_space<vmem>>, vector<1x1x8x32xf32>
    %23 = vector.shape_cast %22 : vector<1x1x8x32xf32> to vector<8x32xf32>
    %24 = vector.shape_cast %21 : vector<8x32xf32> to vector<1x1x8x32xf32>
    tpu.vector_store %arg5[%c0_19, %c0_20, %c0_21, %c0_22], %24 {strides = array<i32>} : memref<1x1x8x32xf32, #tpu.memory_space<vmem>>, vector<1x1x8x32xf32>,
    return
  }
  func.func @transform_0(%arg0: i32, %arg1: i32) -> (i32, i32, i32, i32) {
    %c0_i32 = arith.constant 0 : i32
    %c0_i32_0 = arith.constant 0 : i32
    %c0_i32_1 = arith.constant 0 : i32
    return %arg0, %arg1, %c0_i32, %c0_i32_0 : i32, i32, i32, i32
  }
  func.func @transform_1(%arg0: i32, %arg1: i32) -> (i32, i32, i32, i32) {
    %c0_i32 = arith.constant 0 : i32
    %c0_i32_0 = arith.constant 0 : i32
    %c0_i32_1 = arith.constant 0 : i32
    return %arg0, %arg1, %c0_i32, %c0_i32_0 : i32, i32, i32, i32
  }
  func.func @transform_2(%arg0: i32, %arg1: i32) -> (i32, i32, i32, i32) {
    %c0_i32 = arith.constant 0 : i32
    %c0_i32_0 = arith.constant 0 : i32
    %c0_i32_1 = arith.constant 0 : i32
    return %arg0, %arg1, %c0_i32, %c0_i32_0 : i32, i32, i32, i32
  }
  func.func @transform_3(%arg0: i32, %arg1: i32) -> (i32, i32, i32, i32) {
    %c0_i32 = arith.constant 0 : i32
    %c0_i32_0 = arith.constant 0 : i32
    %c0_i32_1 = arith.constant 0 : i32
    return %arg0, %arg1, %c0_i32, %c0_i32_0 : i32, i32, i32, i32
  }
  func.func @transform_4(%arg0: i32, %arg1: i32) -> (i32, i32, i32, i32) {
    %c0_i32 = arith.constant 0 : i32
    %c0_i32_0 = arith.constant 0 : i32
    %c0_i32_1 = arith.constant 0 : i32
    return %arg0, %arg1, %c0_i32, %c0_i32_0 : i32, i32, i32, i32
  }
}

module attributes {stable_mosaic.version = 11 : i64} {
  func.func @_qkv_proj_kernel(%arg0: i32, %arg1: memref<16x64xf32, #tpu.memory_space<vmem>>, %arg2: memref<16x64xf32, #tpu.memory_space<vmem>>, %arg3: memref<16x64xf32, #tpu.memory_space<vmem>>, %arg4: memref<3x64x128xf32, #tpu.memory_space<vmem>>, %arg5: memref<3x1x128xf32, #tpu.memory_space<vmem>>, %arg6: memref<16x128xf32, #tpu.memory_space<vmem>>, %arg7: memref<16x128xf32, #tpu.memory_space<vmem>>, %arg8: memref<16x128xf32, #tpu.memory_space<vmem>>) attributes {dimension_semantics = [#tpu.dimension_semantics<parallel>], iteration_bounds = array<i64: 1>, scalar_prefetch = 0 : i64, scratch_operands = 0 : i64, tpu.core_type = #tpu.core_type<tc>, window_params = [{transform_indices = @transform_0, window_bounds = array<i64: 16, 64>}, {transform_indices = @transform_1, window_bounds = array<i64: 16, 64>}, {transform_indices = @transform_2, window_bounds = array<i64: 16, 64>}, {pipeline_mode = #tpu.pipeline_mode<synchronous>, transform_indices = @transform_3, window_bounds = array<i64: 3, 64, 128>}, {pipeline_mode = #tpu.pipeline_mode<synchronous>, transform_indices = @transform_4, window_bounds = array<i64: 3, 1, 128>}, {transform_indices = @transform_5, window_bounds = array<i64: 16, 128>}, {transform_indices = @transform_6, window_bounds = array<i64: 16, 128>}, {transform_indices = @transform_7, window_bounds = array<i64: 16, 128>}]} {
    %c0 = arith.constant 0 : index
    %c0_0 = arith.constant 0 : index
    %0 = vector.load %arg1[%c0, %c0_0] : memref<16x64xf32, #tpu.memory_space<vmem>>, vector<16x64xf32>
    %c0_1 = arith.constant 0 : index
    %c0_2 = arith.constant 0 : index
    %c0_3 = arith.constant 0 : index
    %1 = vector.load %arg4[%c0_1, %c0_2, %c0_3] : memref<3x64x128xf32, #tpu.memory_space<vmem>>, vector<1x64x128xf32>
    %2 = vector.shape_cast %1 : vector<1x64x128xf32> to vector<64x128xf32>
    %cst = arith.constant dense<0.000000e+00> : vector<16x128xf32>
    %3 = tpu.matmul %0, %2, %cst {dimension_numbers = #tpu.dot_dimension_numbers<[1], [0], [0], [1], [0, 0, 1, 1], [], []>} : vector<16x64xf32>, vector<64x128xf32>, vector<16x128xf32> -> vector<16x128xf32>
    %c0_4 = arith.constant 0 : index
    %c0_5 = arith.constant 0 : index
    %c0_6 = arith.constant 0 : index
    %4 = vector.load %arg5[%c0_4, %c0_5, %c0_6] : memref<3x1x128xf32, #tpu.memory_space<vmem>>, vector<1x1x128xf32>
    %5 = vector.shape_cast %4 : vector<1x1x128xf32> to vector<1x128xf32>
    %6 = vector.broadcast %5 : vector<1x128xf32> to vector<16x128xf32>
    %7 = arith.addf %3, %6 : vector<16x128xf32>
    %c0_7 = arith.constant 0 : index
    %c0_8 = arith.constant 0 : index
    %8 = vector.load %arg6[%c0_7, %c0_8] : memref<16x128xf32, #tpu.memory_space<vmem>>, vector<16x128xf32>
    tpu.vector_store %arg6[%c0_7, %c0_8], %7 {strides = array<i32>} : memref<16x128xf32, #tpu.memory_space<vmem>>, vector<16x128xf32>,
    %c0_9 = arith.constant 0 : index
    %c0_10 = arith.constant 0 : index
    %9 = vector.load %arg2[%c0_9, %c0_10] : memref<16x64xf32, #tpu.memory_space<vmem>>, vector<16x64xf32>
    %c1 = arith.constant 1 : index
    %c0_11 = arith.constant 0 : index
    %c0_12 = arith.constant 0 : index
    %10 = vector.load %arg4[%c1, %c0_11, %c0_12] : memref<3x64x128xf32, #tpu.memory_space<vmem>>, vector<1x64x128xf32>
    %11 = vector.shape_cast %10 : vector<1x64x128xf32> to vector<64x128xf32>
    %cst_13 = arith.constant dense<0.000000e+00> : vector<16x128xf32>
    %12 = tpu.matmul %9, %11, %cst_13 {dimension_numbers = #tpu.dot_dimension_numbers<[1], [0], [0], [1], [0, 0, 1, 1], [], []>} : vector<16x64xf32>, vector<64x128xf32>, vector<16x128xf32> -> vector<16x128xf32>
    %c1_14 = arith.constant 1 : index
    %c0_15 = arith.constant 0 : index
    %c0_16 = arith.constant 0 : index
    %13 = vector.load %arg5[%c1_14, %c0_15, %c0_16] : memref<3x1x128xf32, #tpu.memory_space<vmem>>, vector<1x1x128xf32>
    %14 = vector.shape_cast %13 : vector<1x1x128xf32> to vector<1x128xf32>
    %15 = vector.broadcast %14 : vector<1x128xf32> to vector<16x128xf32>
    %16 = arith.addf %12, %15 : vector<16x128xf32>
    %c0_17 = arith.constant 0 : index
    %c0_18 = arith.constant 0 : index
    %17 = vector.load %arg7[%c0_17, %c0_18] : memref<16x128xf32, #tpu.memory_space<vmem>>, vector<16x128xf32>
    tpu.vector_store %arg7[%c0_17, %c0_18], %16 {strides = array<i32>} : memref<16x128xf32, #tpu.memory_space<vmem>>, vector<16x128xf32>,
    %c0_19 = arith.constant 0 : index
    %c0_20 = arith.constant 0 : index
    %18 = vector.load %arg3[%c0_19, %c0_20] : memref<16x64xf32, #tpu.memory_space<vmem>>, vector<16x64xf32>
    %c2 = arith.constant 2 : index
    %c0_21 = arith.constant 0 : index
    %c0_22 = arith.constant 0 : index
    %19 = vector.load %arg4[%c2, %c0_21, %c0_22] : memref<3x64x128xf32, #tpu.memory_space<vmem>>, vector<1x64x128xf32>
    %20 = vector.shape_cast %19 : vector<1x64x128xf32> to vector<64x128xf32>
    %cst_23 = arith.constant dense<0.000000e+00> : vector<16x128xf32>
    %21 = tpu.matmul %18, %20, %cst_23 {dimension_numbers = #tpu.dot_dimension_numbers<[1], [0], [0], [1], [0, 0, 1, 1], [], []>} : vector<16x64xf32>, vector<64x128xf32>, vector<16x128xf32> -> vector<16x128xf32>
    %c2_24 = arith.constant 2 : index
    %c0_25 = arith.constant 0 : index
    %c0_26 = arith.constant 0 : index
    %22 = vector.load %arg5[%c2_24, %c0_25, %c0_26] : memref<3x1x128xf32, #tpu.memory_space<vmem>>, vector<1x1x128xf32>
    %23 = vector.shape_cast %22 : vector<1x1x128xf32> to vector<1x128xf32>
    %24 = vector.broadcast %23 : vector<1x128xf32> to vector<16x128xf32>
    %25 = arith.addf %21, %24 : vector<16x128xf32>
    %c0_27 = arith.constant 0 : index
    %c0_28 = arith.constant 0 : index
    %26 = vector.load %arg8[%c0_27, %c0_28] : memref<16x128xf32, #tpu.memory_space<vmem>>, vector<16x128xf32>
    tpu.vector_store %arg8[%c0_27, %c0_28], %25 {strides = array<i32>} : memref<16x128xf32, #tpu.memory_space<vmem>>, vector<16x128xf32>,
    return
  }
  func.func @transform_0(%arg0: i32) -> (i32, i32) {
    %c0_i32 = arith.constant 0 : i32
    %c0_i32_0 = arith.constant 0 : i32
    return %arg0, %c0_i32 : i32, i32
  }
  func.func @transform_1(%arg0: i32) -> (i32, i32) {
    %c0_i32 = arith.constant 0 : i32
    %c0_i32_0 = arith.constant 0 : i32
    return %arg0, %c0_i32 : i32, i32
  }
  func.func @transform_2(%arg0: i32) -> (i32, i32) {
    %c0_i32 = arith.constant 0 : i32
    %c0_i32_0 = arith.constant 0 : i32
    return %arg0, %c0_i32 : i32, i32
  }
  func.func @transform_3(%arg0: i32) -> (i32, i32, i32) {
    %c0_i32 = arith.constant 0 : i32
    %c0_i32_0 = arith.constant 0 : i32
    %c0_i32_1 = arith.constant 0 : i32
    %c0_i32_2 = arith.constant 0 : i32
    return %c0_i32, %c0_i32_0, %c0_i32_1 : i32, i32, i32
  }
  func.func @transform_4(%arg0: i32) -> (i32, i32, i32) {
    %c0_i32 = arith.constant 0 : i32
    %c0_i32_0 = arith.constant 0 : i32
    %c0_i32_1 = arith.constant 0 : i32
    %c0_i32_2 = arith.constant 0 : i32
    return %c0_i32, %c0_i32_0, %c0_i32_1 : i32, i32, i32
  }
  func.func @transform_5(%arg0: i32) -> (i32, i32) {
    %c0_i32 = arith.constant 0 : i32
    %c0_i32_0 = arith.constant 0 : i32
    return %arg0, %c0_i32 : i32, i32
  }
  func.func @transform_6(%arg0: i32) -> (i32, i32) {
    %c0_i32 = arith.constant 0 : i32
    %c0_i32_0 = arith.constant 0 : i32
    return %arg0, %c0_i32 : i32, i32
  }
  func.func @transform_7(%arg0: i32) -> (i32, i32) {
    %c0_i32 = arith.constant 0 : i32
    %c0_i32_0 = arith.constant 0 : i32
    return %arg0, %c0_i32 : i32, i32
  }
}

module attributes {stable_mosaic.version = 11 : i64} {
  func.func @_fc_merge_kernel(%arg0: i32, %arg1: i32, %arg2: memref<1x1x8x32xf32, #tpu.memory_space<vmem>>, %arg3: memref<1x32x128xf32, #tpu.memory_space<vmem>>, %arg4: memref<1x128xf32, #tpu.memory_space<vmem>>, %arg5: memref<1x8x128xf32, #tpu.memory_space<vmem>>, %arg6: memref<8x128xf32, #tpu.memory_space<vmem>>) attributes {dimension_semantics = [#tpu.dimension_semantics<parallel>, #tpu.dimension_semantics<arbitrary>], iteration_bounds = array<i64: 2, 4>, scalar_prefetch = 0 : i64, scratch_operands = 1 : i64, tpu.core_type = #tpu.core_type<tc>, window_params = [{transform_indices = @transform_0, window_bounds = array<i64: 1, 1, 8, 32>}, {transform_indices = @transform_1, window_bounds = array<i64: 1, 32, 128>}, {pipeline_mode = #tpu.pipeline_mode<synchronous>, transform_indices = @transform_2, window_bounds = array<i64: 1, 128>}, {transform_indices = @transform_3, window_bounds = array<i64: 1, 8, 128>}]} {
    %c0_i32 = arith.constant 0 : i32
    %0 = arith.cmpi eq, %arg1, %c0_i32 : i32
    %1 = arith.extui %0 : i1 to i32
    %c0_i32_0 = arith.constant 0 : i32
    %2 = arith.cmpi ne, %1, %c0_i32_0 : i32
    scf.if %2 {
      %cst_12 = arith.constant 0.000000e+00 : f32
      %14 = vector.broadcast %cst_12 : f32 to vector<8x128xf32>
      %c0_13 = arith.constant 0 : index
      %c0_14 = arith.constant 0 : index
      %15 = vector.load %arg6[%c0_13, %c0_14] : memref<8x128xf32, #tpu.memory_space<vmem>>, vector<8x128xf32>
      tpu.vector_store %arg6[%c0_13, %c0_14], %14 {strides = array<i32>} : memref<8x128xf32, #tpu.memory_space<vmem>>, vector<8x128xf32>,
    } else {
    }
    %c0 = arith.constant 0 : index
    %c0_1 = arith.constant 0 : index
    %3 = vector.load %arg6[%c0, %c0_1] : memref<8x128xf32, #tpu.memory_space<vmem>>, vector<8x128xf32>
    %c0_2 = arith.constant 0 : index
    %c0_3 = arith.constant 0 : index
    %c0_4 = arith.constant 0 : index
    %c0_5 = arith.constant 0 : index
    %4 = vector.load %arg2[%c0_2, %c0_3, %c0_4, %c0_5] : memref<1x1x8x32xf32, #tpu.memory_space<vmem>>, vector<1x1x8x32xf32>
    %5 = vector.shape_cast %4 : vector<1x1x8x32xf32> to vector<8x32xf32>
    %c0_6 = arith.constant 0 : index
    %c0_7 = arith.constant 0 : index
    %c0_8 = arith.constant 0 : index
    %6 = vector.load %arg3[%c0_6, %c0_7, %c0_8] : memref<1x32x128xf32, #tpu.memory_space<vmem>>, vector<1x32x128xf32>
    %7 = vector.shape_cast %6 : vector<1x32x128xf32> to vector<32x128xf32>
    %cst = arith.constant dense<0.000000e+00> : vector<8x128xf32>
    %8 = tpu.matmul %5, %7, %cst {dimension_numbers = #tpu.dot_dimension_numbers<[1], [0], [0], [1], [0, 0, 1, 1], [], []>} : vector<8x32xf32>, vector<32x128xf32>, vector<8x128xf32> -> vector<8x128xf32>
    %9 = arith.addf %3, %8 : vector<8x128xf32>
    %c0_9 = arith.constant 0 : index
    %c0_10 = arith.constant 0 : index
    %10 = vector.load %arg6[%c0_9, %c0_10] : memref<8x128xf32, #tpu.memory_space<vmem>>, vector<8x128xf32>
    tpu.vector_store %arg6[%c0_9, %c0_10], %9 {strides = array<i32>} : memref<8x128xf32, #tpu.memory_space<vmem>>, vector<8x128xf32>,
    %c3_i32 = arith.constant 3 : i32
    %11 = arith.cmpi eq, %arg1, %c3_i32 : i32
    %12 = arith.extui %11 : i1 to i32
    %c0_i32_11 = arith.constant 0 : i32
    %13 = arith.cmpi ne, %12, %c0_i32_11 : i32
    scf.if %13 {
      %c0_12 = arith.constant 0 : index
      %c0_13 = arith.constant 0 : index
      %14 = vector.load %arg6[%c0_12, %c0_13] : memref<8x128xf32, #tpu.memory_space<vmem>>, vector<8x128xf32>
      %c0_14 = arith.constant 0 : index
      %c0_15 = arith.constant 0 : index
      %15 = vector.load %arg4[%c0_14, %c0_15] : memref<1x128xf32, #tpu.memory_space<vmem>>, vector<1x128xf32>
      %16 = vector.broadcast %15 : vector<1x128xf32> to vector<8x128xf32>
      %17 = arith.addf %14, %16 : vector<8x128xf32>
      %c0_16 = arith.constant 0 : index
      %c0_17 = arith.constant 0 : index
      %c0_18 = arith.constant 0 : index
      %18 = vector.load %arg5[%c0_16, %c0_17, %c0_18] : memref<1x8x128xf32, #tpu.memory_space<vmem>>, vector<1x8x128xf32>
      %19 = vector.shape_cast %18 : vector<1x8x128xf32> to vector<8x128xf32>
      %20 = vector.shape_cast %17 : vector<8x128xf32> to vector<1x8x128xf32>
      tpu.vector_store %arg5[%c0_16, %c0_17, %c0_18], %20 {strides = array<i32>} : memref<1x8x128xf32, #tpu.memory_space<vmem>>, vector<1x8x128xf32>,
    } else {
    }
    return
  }
  func.func @transform_0(%arg0: i32, %arg1: i32) -> (i32, i32, i32, i32) {
    %c0_i32 = arith.constant 0 : i32
    %c0_i32_0 = arith.constant 0 : i32
    %c0_i32_1 = arith.constant 0 : i32
    return %arg0, %arg1, %c0_i32, %c0_i32_0 : i32, i32, i32, i32
  }
  func.func @transform_1(%arg0: i32, %arg1: i32) -> (i32, i32, i32) {
    %c0_i32 = arith.constant 0 : i32
    %c0_i32_0 = arith.constant 0 : i32
    %c0_i32_1 = arith.constant 0 : i32
    return %arg1, %c0_i32, %c0_i32_0 : i32, i32, i32
  }
  func.func @transform_2(%arg0: i32, %arg1: i32) -> (i32, i32) {
    %c0_i32 = arith.constant 0 : i32
    %c0_i32_0 = arith.constant 0 : i32
    %c0_i32_1 = arith.constant 0 : i32
    return %c0_i32, %c0_i32_0 : i32, i32
  }
  func.func @transform_3(%arg0: i32, %arg1: i32) -> (i32, i32, i32) {
    %c0_i32 = arith.constant 0 : i32
    %c0_i32_0 = arith.constant 0 : i32
    %c0_i32_1 = arith.constant 0 : i32
    return %arg0, %c0_i32, %c0_i32_0 : i32, i32, i32
  }
}

</mosaic_0001>

<bundles_post_ra>
// kernel: tpu_custom_call.1
= control target key start
LH: loop header
LB: loop body
LE: loop exit
PB: predicated region body
PF: predicated region fallthrough
CT: control target
= control target key end

     0   :  { %6 = vsyncpa [#allocation3], 0  ;;  %s305_s0 = inlined_call_operand.hbm [shape: f32[8,128], index: 0, kind: input, shape index: {}]   ;;  %s306_s1 = inlined_call_operand.hbm [shape: f32[8,128], index: 1, kind: output, shape index: {}]  }
   0x1   :  { %7 = vsyncpa [#allocation4], 0  ;;  %s258_s6 = smov 0  }
   0x2 LB: > { %s145_s7 = sadd.s32 4294967295, %s244_s6   ;;  %p146_p0 = scmp.ge.s32.totalorder %s244_s6, 1  ;;  %s244_s6 = sphi %s258_s6, %s13_s6  }
   0x3   : > { %p60_p1 = scmp.lt.s32.totalorder %s244_s6, 3  ;;  %p270_p3 = scmp.eq.s32.totalorder %s145_s7, 0 }
   0x4   : > { %s246_s10 = smov [#allocation2]  }
   0x5   : > { %p266_p2 = pnand %p146_p0, %p60_p1  ;;  %s73_s11 = sshll.u32 %s246_s10, 4  ;;  %s74_s11 = int_to_ptr.vmem [resolvable:$true] %s73_s11 }
   0x6   : > { %s191_s12 = scalar_lea.vmem %s74_s11, 128  ;;  %p199_p10 = scmp.lt.s32.totalorder %s74_s11, %s74_s11 }
   0x7   : > { %p162_p4 = pneg %p266_p2  ;;  %p192_p7 = scmp.ne.s32.totalorder %s74_s11, %s191_s12 }
   0x8   : > { %p200_p11 = scmp.lt.s32.totalorder %s191_s12, %s191_s12 }
   0x9   : > { %p163_p5 = pnand %p270_p3, %p162_p4 }
   0xa   : > { %p201_p12 = por %p200_p11, %p199_p10 }
   0xb   : > { %p182_p6 = pneg %p163_p5 }
   0xd   : > { %p194_p8 = pnand %p192_p7, %p182_p6 }
   0xf   : > { %p195_p9 = pneg %p194_p8 }
  0x11   : > { %p202_p13 = pnand %p201_p12, %p195_p9 }
  0x13   : > { %205 = shalt.err (!%p202_p13)
}
  0x14   : > { %165 = dma.hbm_to_vmem [thread:$0]  (!%p163_p5), %s305_s0, 128, %s74_s11, [#allocation3]  }
  0x15   : > { %86 = sbr.rel (%p266_p2) target bundleno = 42 (0x2a), region = 24 }
  0x1a   : > { %235 = dma.done.wait (%p270_p3), [#allocation3], 128  }
  0x1b   : > { %237 = vsyncadd (%p270_p3), [#allocation3], 4294967168  ;;  %s247_s15 = smov [#allocation5]   ;;  %v96_v0 = vld [vmem:[#allocation2] sm:$0xff]  ;;  %p287_p0 = scmp.eq.s32.totalorder %s145_s7, 1 }
  0x1c   : > { %s106_s16 = sshll.u32 %s247_s15, 4  ;;  %v97_v1 = vmul.f32 2.0, %v96_v0  ;;  %s107_s16 = int_to_ptr.vmem [resolvable:$true] %s106_s16 }
  0x1d   : > { %s206_s18 = scalar_lea.vmem %s107_s16, 128  ;;  %p213_p5 = scmp.lt.s32.totalorder %s107_s16, %s107_s16 }
  0x1e   : > { %98 = vst [vmem:[#allocation5] sm:$0xff] %v97_v1  ;;  %p207_p1 = scmp.ne.s32.totalorder %s107_s16, %s206_s18  ;;  %p214_p6 = scmp.lt.s32.totalorder %s206_s18, %s206_s18 }
  0x20   : > { %p208_p2 = pnand %p207_p1, %p287_p0  ;;  %p215_p7 = por %p214_p6, %p213_p5 }
  0x22   : > { %p209_p4 = pneg %p208_p2 }
  0x24   : > { %p216_p3 = pnand %p215_p7, %p209_p4 }
  0x26   : > { %219 = shalt.err (!%p216_p3)
}
  0x27   : > { %159 = dma.vmem_to_hbm [thread:$0]  (%p287_p0), %s107_s16, 128, %s306_s1, [#allocation4]  }
  0x28   : > { %239 = dma.done.wait (%p287_p0), [#allocation4], 128  }
  0x29   : > { %241 = vsyncadd (%p287_p0), [#allocation4], 4294967168 }
  0x2a PF: > { %s13_s6 = sadd.s32 1, %s244_s6  }
  0x2b   : > { %p10_p8 = scmp.ge.s32.totalorder %s13_s6, 4  }
  0x2d   :  { %12 = sbr.rel (!%p10_p8) target bundleno = 2 (0x2), region = 53 }
  0x32   :  { %119 = vsyncpa [#allocation3], 1 }
  0x33   :  { %121 = vsyncpa [#allocation3 + $0x1], 1 }
  0x34   :  { %122 = vsyncpa [#allocation4], 1 }
  0x35   :  { %124 = vsyncpa [#allocation4 + $0x1], 1 }

// kernel: _mha_forward_cross.4
= control target key start
LH: loop header
LB: loop body
LE: loop exit
PB: predicated region body
PF: predicated region fallthrough
CT: control target
= control target key end

     0   :  { %s1030_s0 = inlined_call_operand.vmem [shape: f32[2,4,8,32], index: 0, kind: input, shape index: {}]   ;;  %s1031_s1 = inlined_call_operand.vmem [shape: f32[2,4,8,32], index: 1, kind: input, shape index: {}]   ;;  %s1032_s2 = inlined_call_operand.vmem [shape: f32[2,4,8,32], index: 2, kind: input, shape index: {}]   ;;  %s1033_s3 = inlined_call_operand.vmem [shape: f32[2,4,8,32], index: 3, kind: output, shape index: {0}]   ;;  %s1034_s4 = inlined_call_operand.hbm [shape: f32[2,4,8,8], index: 4, kind: output, shape index: {1}]  }
   0x1   :  { %1035 = sst [smem:[#allocation5_spill]] %s1030_s0 }
   0x2   :  { %1036 = sst [smem:[#allocation6_spill]] %s1031_s1 }
   0x3   :  { %10 = vsyncpa [#allocation3], 0 }
   0x4   :  { %12 = vsyncpa [#allocation3 + $0x1], 0  ;;  %s884_s15 = smov 0   ;;  %s886_s16 = smov 0  }
   0x5   :  { %s888_s17 = smov 0   ;;  %s890_s18 = smov 0  }
   0x6   :  { %s892_s19 = smov 0   ;;  %s894_s20 = smov 0  }
   0x7   :  { %s896_s21 = smov 0   ;;  %s898_s22 = smov 0  }
   0x8 LB: > { %s649_s23 = sadd.s32 4294967295, %s854_s22   ;;  %s650_s24 = sadd.s32 4294967294, %s854_s22   ;;  %s854_s22 = sphi %s898_s22, %s18_s22   ;;  %s850_s21 = sphi %s896_s21, %s1047_s21   ;;  %s846_s20 = sphi %s894_s20, %s1046_s20   ;;  %s842_s19 = sphi %s892_s19, %s1045_s19   ;;  %s838_s18 = sphi %s890_s18, %s1044_s18   ;;  %s834_s17 = sphi %s888_s17, %s1043_s17   ;;  %s830_s16 = sphi %s886_s16, %s1042_s16   ;;  %s826_s15 = sphi %s884_s15, %s1041_s15  }
   0x9   : > { %s27_s25 = sadd.s32 1, %s846_s20  ;;  %s30_s26 = sadd.s32 1, %s850_s21 }
   0xa   : > { %p28_p0 = scmp.ge.s32.totalorder %s27_s25, 4  ;;  %p161_p1 = scmp.ne.s32.totalorder %s834_s17, %s830_s16 }
   0xb   : > { %p162_p2 = scmp.eq.s32.totalorder %s649_s23, 7  ;;  %p167_p5 = scmp.ne.s32.totalorder %s830_s16, %s826_s15 }
   0xc   : > { %s1049_s25 = smov (%p28_p0, %s27_s25), 0  ;;  %s1051_s26 = smov (!%p28_p0, %s30_s26), %s850_s21 }
   0xd   : > { %s147_s27 = ssub.s32 %s846_s20, %s1049_s25  ;;  %p935_p3 = por %p162_p2, %p161_p1 }
   0xe   : > { %p32_p4 = scmp.ge.s32.totalorder %s1051_s26, 2  ;;  %p168_p6 = scmp.eq.s32.totalorder %s650_s24, 7 }
   0xf   : > { %p653_p7 = scmp.ge.s32.totalorder %s854_s22, 1  ;;  %p219_p9 = scmp.lt.s32.totalorder %s854_s22, 9 }
  0x10   : > { %s1053_s26 = smov (%p32_p4, %s1051_s26), 0  ;;  %p944_p8 = por %p168_p6, %p167_p5 }
  0x11   : > { %s146_s30 = ssub.s32 %s850_s21, %s1053_s26  ;;  %s151_s5 = sadd.s32 1, %s834_s17 }
  0x12   : > { %s148_s6 = sor.u32 %s147_s27, %s146_s30  ;;  %p220_p10 = pnand %p653_p7, %p219_p9 }
  0x13   : > { %p149_p11 = scmp.eq.s32.totalorder %s148_s6, 0  ;;  %p272_p12 = scmp.lt.s32.totalorder (!%p220_p10), %s842_s19, 1 }
  0x14   : > { %223 = sbr.rel (%p220_p10) target bundleno = 737 (0x2e1), region = 32  ;;  %p274_p13 = scmp.lt.s32.totalorder (!%p220_p10), %s838_s18, 3 }
  0x15   : > { %s953_s7 = scalar_select %p149_p11, %s834_s17, %s151_s5  }
  0x16   : > { %s1039_s1 = sld [smem:[#allocation6_spill]] (!%p220_p10)  ;;  %s667_s13 = sshll.u32 (!%p220_p10), %s842_s19, 2 }
  0x17   : > { %s1040_s0 = sld [smem:[#allocation5_spill]] (!%p220_p10)  ;;  %s495_s14 = sadd.s32 (!%p220_p10), %s838_s18, %s667_s13 }
  0x19   : > { %v856_v0 = vmov 0.0   ;;  %vm857_vm0 = vmmov 0   ;;  %s273_s8 = scalar_select %p272_p12, %s842_s19, 1  ;;  %vm307_vm1 = vcmask 261120   ;;  %vm385_vm2 = vcmask 64512  }
  0x1a   : > { %675 = vmatprep.subr.mxu0 %v856_v0  ;;  %677 = vmatprep.mubr.msk.f32.mxu0 %vm857_vm0, %v856_v0  ;;  %s275_s9 = scalar_select %p274_p13, %s838_s18, 3 }
  0x1b   : > { %680 = vmatprep.subr.mxu1 %v856_v0  ;;  %682 = vmatprep.mubr.msk.f32.mxu1 %vm857_vm0, %v856_v0  ;;  %s655_s10 = sshll.u32 %s273_s8, 2 }
  0x1c   : > { %s277_s11 = sadd.s32 %s655_s10, %s275_s9  ;;  %s269_s9 = sand.u32 1, %s830_s16  }
  0x1d   : > { %s959_s12 = sshll.u32 %s277_s11, 3  ;;  %s654_s10 = sshll.u32 %s269_s9, 3 }
  0x1e   : > { %s287_s23 = scalar_lea.vmem %s1039_s1, %s959_s12  ;;  %s295_s30 = scalar_lea.vmem %s1032_s2, %s959_s12 }
  0x1f   : > { %v305_v1 = vld [vmem:[%s287_s23] sm:$0xff]  ;;  %s279_s8 = scalar_lea.vmem %s1040_s0, %s959_s12  ;;  %s271_s11 = scalar_lea.vmem [#allocation2], %s654_s10 }
  0x20   : > { %676 = vmatpush3.xpose.msk.msra.mxu0 %vm307_vm1, %v305_v1  ;;  %v306_v2 = vld [vmem:[%s295_s30] sm:$0xff]  ;;  %s668_s23 = sshll.u32 %s495_s14, 7  ;;  %s499_s24 = sshll.u32 %s271_s11, 4  ;;  %s500_s24 = int_to_ptr.vmem [resolvable:$true] %s499_s24 }
  0x21   : > { %v304_v12 = vld [vmem:[%s279_s8] sm:$0xff]  ;;  %s497_s5 = scalar_lea.hbm %s1034_s4, %s668_s23  ;;  %s481_s6 = scalar_lea.sflag [#allocation3], %s269_s9 }
  0x22   : > { %681 = vmatpush3.msra.mxu1 %v304_v12  ;;  %s762_s8 = scalar_lea.vmem %s500_s24, 128  ;;  %s858_s0 = smov [#allocation2]  }
  0x23   : > { %678 = vmatmul.mubr.msk.f32.vlgmr.msra.gmra.mxu0 %vm307_vm1, %v306_v2  ;;  %p763_p0 = scmp.ne.s32.totalorder %s500_s24, %s762_s8  ;;  %s766_s1 = sshll.u32 %s858_s0, 4  ;;  %s767_s1 = int_to_ptr.vmem [resolvable:$false] %s766_s1 }
  0x24   : > { %s768_s10 = scalar_lea.vmem %s767_s1, 256  ;;  %p769_p4 = scmp.lt.s32.totalorder %s500_s24, %s767_s1 }
  0x25   : > { %p764_p1 = pnand %p763_p0, %p935_p3  ;;  %p770_p5 = scmp.lt.s32.totalorder %s768_s10, %s762_s8 }
  0x27   : > { %p765_p2 = pneg %p764_p1  ;;  %p771_p6 = por %p770_p5, %p769_p4 }
  0x29   : > { %p772_p7 = pnand %p771_p6, %p765_p2 }
  0xe3   : > { %v380_v3 = vpop.f32.mrf.mxu0 }
  0xe4   : > { %v384_v4 = vmul.f32 0.17677669, %v380_v3 }
  0xe5   : > { %v679_v5 = vpop.f32.mrf.mxu0 }
  0xe6   : > { %v386_v6 = vsel %vm385_vm2, %v384_v4, -inf }
  0xe7   : > { %387 = vmax.xlane.f32.xlu0 %v386_v6 }
 0x170   : > { %v388_v7 = vpop.xlane.xlu0 %387 }
 0x171   : > { %v389_v8 = vsub.f32 %v384_v4, %v388_v7 }
 0x173   : > { %v390_v9 = vmul.f32 1.442695, %v389_v8 }
 0x175   : > { %758 = vpow2.f32 %v390_v9 }
 0x182   : > { %v759_v10 = vpop.eup %758 }
 0x183   : > { %v392_v11 = vsel %vm385_vm2, %v759_v10, 0.0 }
 0x184   : > { %393 = vadd.xlane.f32.xlu0 %v392_v11 }
 0x20d   : > { %v394_v13 = vpop.xlane.xlu0 %393 }
 0x20e   : > { %760 = vrcp.f32 %v394_v13 }
 0x21b   : > { %v761_v14 = vpop.eup %760 }
 0x21c   : > { %v396_v15 = vmul.f32 %v761_v14, %v759_v10 }
 0x21e   : > { %683 = vmatmul.mubr.msk.f32.vlgmr.msra.gmra.mxu1 %vm385_vm2, %v396_v15  ;;  %397 = vst.msk [vmem:[%s271_s11] sm:$0xff] %vm385_vm2, %v396_v15 }
 0x21f   : > { %775 = shalt.err (!%p772_p7)
}
 0x220   : > { %s776_s18 = scalar_lea.hbm %s497_s5, 128  ;;  %s780_s11 = scalar_lea.hbm %s1034_s4, 1024 }
 0x221   : > { %p777_p9 = scmp.ne.s32.totalorder %s497_s5, %s776_s18  ;;  %p781_p12 = scmp.lt.s32.totalorder %s497_s5, %s1034_s4 }
 0x222   : > { %p782_p13 = scmp.lt.s32.totalorder %s780_s11, %s776_s18 }
 0x223   : > { %p778_p10 = pnand %p777_p9, %p935_p3 }
 0x224   : > { %p783_p0 = por %p782_p13, %p781_p12 }
 0x225   : > { %p779_p11 = pneg %p778_p10 }
 0x227   : > { %p784_p1 = pnand %p783_p0, %p779_p11 }
 0x229   : > { %787 = shalt.err (!%p784_p1)
}
 0x22a   : > { %685 = dma.vmem_to_hbm [thread:$0]  (%p935_p3), %s500_s24, 128, %s497_s5, %s481_s6  }
 0x22b   : > { %s303_s23 = scalar_lea.vmem %s1033_s3, %s959_s12 }
 0x2de   : > { %v467_v16 = vpop.f32.mrf.mxu1 }
 0x2df   : > { %471 = vst.msk [vmem:[%s303_s23] sm:$0xff] %vm307_vm1, %v467_v16 }
 0x2e0   : > { %v684_v17 = vpop.f32.mrf.mxu1 }
 0x2e1 PF: > { %p691_p2 = scmp.ge.s32.totalorder %s854_s22, 2  ;;  %s522_s27 = sand.u32 1, %s826_s15  }
 0x2e2   : > { %s523_s28 = scalar_lea.sflag [#allocation3], %s522_s27 }
 0x2e3   : > { %p688_p4 = pnand %p691_p2, %p944_p8 }
 0x2e5   : > { %p689_p5 = pneg %p688_p4 }
 0x2e7   : > { %821 = dma.done.wait (%p689_p5), %s523_s28, 128  }
 0x2e8   : > { %823 = vsyncadd (%p689_p5), %s523_s28, 4294967168  ;;  %s18_s22 = sadd.s32 1, %s854_s22   ;;  %s1041_s15 = smov %s830_s16 }
 0x2e9   : > { %p15_p3 = scmp.ge.s32.totalorder %s18_s22, 10   ;;  %s1042_s16 = smov %s834_s17 }
 0x2ea   : > { %s1043_s17 = smov %s953_s7  ;;  %s1044_s18 = smov %s846_s20 }
 0x2eb   : > { %s1045_s19 = smov %s850_s21  ;;  %s1046_s20 = smov %s1049_s25 }
 0x2ec   : > { %s1047_s21 = smov %s1053_s26  ;;  %17 = sbr.rel (!%p15_p3) target bundleno = 8 (0x8), region = 85 }
 0x2f1   :  { %528 = vsyncpa [#allocation3], 1 }
 0x2f2   :  { %530 = vsyncpa [#allocation3 + $0x1], 1 }

// kernel: _mha_forward_cross.3
= control target key start
LH: loop header
LB: loop body
LE: loop exit
PB: predicated region body
PF: predicated region fallthrough
CT: control target
= control target key end

     0   :  { %13 = vsyncpa [#allocation3], 0  ;;  %s643_s0 = inlined_call_operand.vmem [shape: f32[16,64], index: 0, kind: input, shape index: {}]   ;;  %s644_s1 = inlined_call_operand.hbm [shape: f32[16,64], index: 1, kind: input, shape index: {}]   ;;  %s645_s2 = inlined_call_operand.hbm [shape: f32[16,64], index: 2, kind: input, shape index: {}]   ;;  %s646_s3 = inlined_call_operand.hbm [shape: f32[3,64,128], index: 3, kind: input, shape index: {}]   ;;  %s647_s4 = inlined_call_operand.vmem [shape: f32[3,1,128], index: 4, kind: input, shape index: {}]   ;;  %s648_s5 = inlined_call_operand.vmem [shape: f32[16,128], index: 5, kind: output, shape index: {0}]   ;;  %s649_s6 = inlined_call_operand.vmem [shape: f32[16,128], index: 6, kind: output, shape index: {1}]   ;;  %s650_s7 = inlined_call_operand.vmem [shape: f32[16,128], index: 7, kind: output, shape index: {2}]  }
   0x1   :  { %14 = vsyncpa [#allocation5], 0  ;;  %s550_s24 = smov [#allocation4]   ;;  %s551_s26 = smov [#allocation2]  }
   0x2   :  { %s34_s25 = sshll.u32 %s550_s24, 4  ;;  %s22_s27 = sshll.u32 %s551_s26, 4  ;;  %s35_s25 = int_to_ptr.vmem [resolvable:$true] %s34_s25  ;;  %s23_s27 = int_to_ptr.vmem [resolvable:$true] %s22_s27 }
   0x3   :  { %s494_s28 = scalar_lea.vmem %s35_s25, 256  ;;  %p499_p1 = scmp.lt.s32.totalorder %s35_s25, %s35_s25 }
   0x4   :  { %p495_p0 = scmp.ne.s32.totalorder %s35_s25, %s494_s28  ;;  %p500_p2 = scmp.lt.s32.totalorder %s494_s28, %s494_s28 }
   0x6   :  { %p501_p3 = por %p500_p2, %p499_p1 }
   0x8   :  { %p502_p4 = pnand %p501_p3, %p495_p0 }
   0xa   :  { %505 = shalt.err (!%p502_p4)
}
   0xb   :  { %s552_s29 = smov 128   ;;  %s553_s30 = smov 8  }
   0xc   :  { %40 = dma.hbm_to_vmem [thread:$0]  %s645_s2, 256, %s35_s25, [#allocation5], %s552_s29, %s552_s29, %s553_s30  }
   0xd   :  { %s514_s10 = scalar_lea.vmem %s23_s27, 256  ;;  %p519_p6 = scmp.lt.s32.totalorder %s23_s27, %s23_s27 }
   0xe   :  { %p515_p5 = scmp.ne.s32.totalorder %s23_s27, %s514_s10  ;;  %p520_p7 = scmp.lt.s32.totalorder %s514_s10, %s514_s10 }
  0x10   :  { %p521_p8 = por %p520_p7, %p519_p6 }
  0x12   :  { %p522_p9 = pnand %p521_p8, %p515_p5 }
  0x14   :  { %525 = shalt.err (!%p522_p9)
}
  0x15   :  { %28 = dma.hbm_to_vmem [thread:$0]  %s644_s1, 256, %s23_s27, [#allocation3], %s552_s29, %s552_s29, %s553_s30  }
  0x16   :  { %s554_s13 = smov [#allocation6]  }
  0x17   :  { %s46_s14 = sshll.u32 %s554_s13, 4  ;;  %s47_s14 = int_to_ptr.vmem [resolvable:$true] %s46_s14 }
  0x18   :  { %s534_s15 = scalar_lea.vmem %s47_s14, 3072  ;;  %p539_p11 = scmp.lt.s32.totalorder %s47_s14, %s47_s14 }
  0x19   :  { %p535_p10 = scmp.ne.s32.totalorder %s47_s14, %s534_s15  ;;  %p540_p12 = scmp.lt.s32.totalorder %s534_s15, %s534_s15 }
  0x1b   :  { %p541_p13 = por %p540_p12, %p539_p11 }
  0x1d   :  { %p542_p0 = pnand %p541_p13, %p535_p10 }
  0x1f   :  { %545 = shalt.err (!%p542_p0)
}
  0x20   :  { %52 = dma.hbm_to_vmem [thread:$0]  %s646_s3, 3072, %s47_s14, [#allocation5], %s552_s29, %s552_s29, %s553_s30  }
  0x21   :  { %546 = dma.done.wait [#allocation3], 256  }
  0x22   :  { %547 = vsyncadd [#allocation3], 4294967040 }
  0x23   :  { %548 = dma.done.wait [#allocation5], 3328  }
  0x24   :  { %549 = vsyncadd [#allocation5], 4294963968  ;;  %v73_v0 = vld [vmem:[#allocation6 + $0x38] sm:$0xff]  ;;  %v72_v1 = vld [vmem:[#allocation6 + $0x30] sm:$0xff]  ;;  %vm81_vm0 = vcmask 523264  }
  0x25   :  { %424 = vmatprep.subr.mxu0 %v73_v0  ;;  %v71_v2 = vld [vmem:[#allocation6 + $0x28] sm:$0xff]  ;;  %v175_v3 = vld [vmem:[#allocation6 + $0x78] sm:$0xff]  ;;  %v64_v4 = vld [vmem:[%s643_s0] sm:$0xff] }
  0x26   :  { %425 = vmatpush3.msra.mxu0 %v73_v0  ;;  %443 = vmatprep.subr.mxu1 %v175_v3  ;;  %v174_v5 = vld [vmem:[#allocation6 + $0x70] sm:$0xff]  ;;  %v70_v6 = vld [vmem:[#allocation6 + $0x20] sm:$0xff]  ;;  %v173_v7 = vld [vmem:[#allocation6 + $0x68] sm:$0xff] }
  0x27   :  { %426 = vmatprep.subr.mxu0 %v72_v1  ;;  %440 = vmatprep.mubr.msk.f32.mxu0 %vm81_vm0, %v64_v4  ;;  %v69_v8 = vld [vmem:[#allocation6 + $0x18] sm:$0xff]  ;;  %v172_v9 = vld [vmem:[#allocation6 + $0x60] sm:$0xff]  ;;  %v68_v10 = vld [vmem:[#allocation6 + $0x10] sm:$0xff] }
  0x28   :  { %427 = vmatpush3.msra.mxu0 %v72_v1  ;;  %444 = vmatpush3.msra.mxu1 %v175_v3  ;;  %v171_v11 = vld [vmem:[#allocation6 + $0x58] sm:$0xff]  ;;  %v67_v12 = vld [vmem:[#allocation6 + $0x8] sm:$0xff]  ;;  %v170_v13 = vld [vmem:[#allocation6 + $0x50] sm:$0xff] }
  0x29   :  { %428 = vmatprep.subr.mxu0 %v71_v2  ;;  %445 = vmatprep.subr.mxu1 %v174_v5  ;;  %v66_v14 = vld [vmem:[#allocation6] sm:$0xff]  ;;  %v169_v15 = vld [vmem:[#allocation6 + $0x48] sm:$0xff]  ;;  %v277_v17 = vld [vmem:[#allocation6 + $0xb8] sm:$0xff] }
  0x2a   :  { %429 = vmatpush3.msra.mxu0 %v71_v2  ;;  %446 = vmatpush3.msra.mxu1 %v174_v5  ;;  %v65_v16 = vld [vmem:[%s643_s0 + $0x8] sm:$0xff]  ;;  %v276_v18 = vld [vmem:[#allocation6 + $0xb0] sm:$0xff]  ;;  %v168_v19 = vld [vmem:[#allocation6 + $0x40] sm:$0xff] }
  0x2b   :  { %430 = vmatprep.subr.mxu0 %v70_v6  ;;  %447 = vmatprep.subr.mxu1 %v173_v7  ;;  %v275_v20 = vld [vmem:[#allocation6 + $0xa8] sm:$0xff]  ;;  %v165_v21 = vld [vmem:[#allocation2] sm:$0xff]  ;;  %v267_v24 = vld [vmem:[#allocation4] sm:$0xff] }
  0x2c   :  { %431 = vmatpush3.msra.mxu0 %v70_v6  ;;  %448 = vmatpush3.msra.mxu1 %v173_v7  ;;  %v166_v22 = vld [vmem:[#allocation2 + $0x8] sm:$0xff]  ;;  %v274_v23 = vld [vmem:[#allocation6 + $0xa0] sm:$0xff]  ;;  %v273_v25 = vld [vmem:[#allocation6 + $0x98] sm:$0xff] }
  0x2d   :  { %432 = vmatprep.subr.mxu0 %v69_v8  ;;  %449 = vmatprep.subr.mxu1 %v172_v9  ;;  %v272_v26 = vld [vmem:[#allocation6 + $0x90] sm:$0xff]  ;;  %v271_v27 = vld [vmem:[#allocation6 + $0x88] sm:$0xff]  ;;  %v270_v28 = vld [vmem:[#allocation6 + $0x80] sm:$0xff] }
  0x2e   :  { %433 = vmatpush3.msra.mxu0 %v69_v8  ;;  %450 = vmatpush3.msra.mxu1 %v172_v9  ;;  %v268_v29 = vld [vmem:[#allocation4 + $0x8] sm:$0xff]  ;;  %v383_v30 = vld [vmem:[%s647_s4] ss:$0 sm:$0xff]  ;;  %v387_v35 = vld [vmem:[%s647_s4 + $0x1] ss:$0 sm:$0xff] }
  0x2f   :  { %434 = vmatprep.subr.mxu0 %v68_v10  ;;  %451 = vmatprep.subr.mxu1 %v171_v11  ;;  %v391_v40 = vld [vmem:[%s647_s4 + $0x2] ss:$0 sm:$0xff] }
  0x30   :  { %435 = vmatpush3.msra.mxu0 %v68_v10  ;;  %452 = vmatpush3.msra.mxu1 %v171_v11 }
  0x31   :  { %436 = vmatprep.subr.mxu0 %v67_v12  ;;  %453 = vmatprep.subr.mxu1 %v170_v13 }
  0x32   :  { %437 = vmatpush3.msra.mxu0 %v67_v12  ;;  %454 = vmatpush3.msra.mxu1 %v170_v13 }
  0x33   :  { %438 = vmatprep.subr.mxu0 %v66_v14  ;;  %455 = vmatprep.subr.mxu1 %v169_v15 }
  0x34   :  { %439 = vmatpush3.msra.mxu0 %v66_v14  ;;  %456 = vmatpush3.msra.mxu1 %v169_v15 }
  0x35   :  { %441 = vmatmul.mubr.msk.f32.vlgmr.msra.gmra.mxu0 %vm81_vm0, %v65_v16  ;;  %462 = vmatprep.subr.mxu0 %v277_v17 }
  0x36   :  { %463 = vmatpush3.msra.mxu0 %v277_v17  ;;  %457 = vmatprep.subr.mxu1 %v168_v19 }
  0x37   :  { %464 = vmatprep.subr.mxu0 %v276_v18  ;;  %458 = vmatpush3.msra.mxu1 %v168_v19 }
  0x38   :  { %465 = vmatpush3.msra.mxu0 %v276_v18  ;;  %459 = vmatprep.mubr.msk.f32.mxu1 %vm81_vm0, %v165_v21 }
  0x39   :  { %466 = vmatprep.subr.mxu0 %v275_v20  ;;  %460 = vmatmul.mubr.msk.f32.vlgmr.msra.gmra.mxu1 %vm81_vm0, %v166_v22 }
  0x3a   :  { %467 = vmatpush3.msra.mxu0 %v275_v20  ;;  %478 = vmatprep.mubr.msk.f32.mxu0 %vm81_vm0, %v267_v24 }
  0x3b   :  { %468 = vmatprep.subr.mxu0 %v274_v23 }
  0x3c   :  { %469 = vmatpush3.msra.mxu0 %v274_v23 }
  0x3d   :  { %470 = vmatprep.subr.mxu0 %v273_v25 }
  0x3e   :  { %471 = vmatpush3.msra.mxu0 %v273_v25 }
  0x3f   :  { %472 = vmatprep.subr.mxu0 %v272_v26 }
  0x40   :  { %473 = vmatpush3.msra.mxu0 %v272_v26 }
  0x41   :  { %474 = vmatprep.subr.mxu0 %v271_v27 }
  0x42   :  { %475 = vmatpush3.msra.mxu0 %v271_v27 }
  0x43   :  { %476 = vmatprep.subr.mxu0 %v270_v28 }
  0x44   :  { %477 = vmatpush3.msra.mxu0 %v270_v28 }
  0x45   :  { %479 = vmatmul.mubr.msk.f32.vlgmr.msra.gmra.mxu0 %vm81_vm0, %v268_v29 }
  0xf5   :  { %v442_v31 = vpop.f32.mrf.mxu0 }
  0xf6   :  { %v160_v32 = vadd.f32 %v442_v31, %v383_v30 }
  0xf7   :  { %v154_v33 = vpop.f32.mrf.mxu0 }
  0xf8   :  { %164 = vst [vmem:[%s648_s5 + $0x8] sm:$0xff] %v160_v32  ;;  %v155_v34 = vadd.f32 %v383_v30, %v154_v33 }
  0xf9   :  { %v461_v36 = vpop.f32.mrf.mxu1 }
  0xfa   :  { %163 = vst [vmem:[%s648_s5] sm:$0xff] %v155_v34  ;;  %v262_v37 = vadd.f32 %v461_v36, %v387_v35 }
  0xfb   :  { %v256_v38 = vpop.f32.mrf.mxu1 }
  0xfc   :  { %266 = vst [vmem:[%s649_s6 + $0x8] sm:$0xff] %v262_v37  ;;  %v257_v39 = vadd.f32 %v387_v35, %v256_v38 }
  0xfe   :  { %265 = vst [vmem:[%s649_s6] sm:$0xff] %v257_v39 }
 0x105   :  { %v480_v41 = vpop.f32.mrf.mxu0 }
 0x106   :  { %v364_v42 = vadd.f32 %v480_v41, %v391_v40 }
 0x107   :  { %v358_v43 = vpop.f32.mrf.mxu0 }
 0x108   :  { %368 = vst [vmem:[%s650_s7 + $0x8] sm:$0xff] %v364_v42  ;;  %v359_v44 = vadd.f32 %v391_v40, %v358_v43 }
 0x10a   :  { %367 = vst [vmem:[%s650_s7] sm:$0xff] %v359_v44 }
 0x10b   :  { %381 = vsyncpa [#allocation3], 1 }
 0x10c   :  { %382 = vsyncpa [#allocation5], 1 }

// kernel: _mha_forward_cross.5
= control target key start
LH: loop header
LB: loop body
LE: loop exit
PB: predicated region body
PF: predicated region fallthrough
CT: control target
= control target key end

     0   :  { %8 = vsyncpa [#allocation4], 0  ;;  %s782_s0 = inlined_call_operand.vmem [shape: f32[2,4,8,32], index: 0, kind: input, shape index: {}]   ;;  %s783_s1 = inlined_call_operand.vmem [shape: f32[4,32,128], index: 1, kind: input, shape index: {}]   ;;  %s784_s2 = inlined_call_operand.vmem [shape: f32[1,128], index: 2, kind: input, shape index: {}]   ;;  %s785_s3 = inlined_call_operand.hbm [shape: f32[2,8,128], index: 3, kind: output, shape index: {}]  }
   0x1   :  { %10 = vsyncpa [#allocation4 + $0x1], 0  ;;  %s642_s12 = smov 0   ;;  %s644_s13 = smov 0  }
   0x2   :  { %s646_s14 = smov 0   ;;  %s648_s15 = smov 0  }
   0x3   :  { %s650_s16 = smov 0   ;;  %s652_s17 = smov 0  }
   0x4   :  { %s654_s18 = smov 0   ;;  %s656_s19 = smov 0  }
   0x5 LB: > { %s415_s20 = sadd.s32 4294967295, %s616_s19   ;;  %s416_s21 = sadd.s32 4294967294, %s616_s19   ;;  %s616_s19 = sphi %s656_s19, %s16_s19   ;;  %s612_s18 = sphi %s654_s18, %s797_s18   ;;  %s608_s17 = sphi %s652_s17, %s796_s17   ;;  %s604_s16 = sphi %s650_s16, %s795_s16   ;;  %s600_s15 = sphi %s648_s15, %s794_s15   ;;  %s596_s14 = sphi %s646_s14, %s793_s14   ;;  %s592_s13 = sphi %s644_s13, %s792_s13   ;;  %s588_s12 = sphi %s642_s12, %s791_s12  }
   0x6   : > { %s25_s22 = sadd.s32 1, %s608_s17  ;;  %s28_s23 = sadd.s32 1, %s612_s18 }
   0x7   : > { %p26_p0 = scmp.ge.s32.totalorder %s25_s22, 4  ;;  %p120_p1 = scmp.ne.s32.totalorder %s596_s14, %s592_s13 }
   0x8   : > { %p121_p2 = scmp.eq.s32.totalorder %s415_s20, 7  ;;  %p126_p4 = scmp.ne.s32.totalorder %s592_s13, %s588_s12 }
   0x9   : > { %s799_s22 = smov (%p26_p0, %s25_s22), 0  ;;  %s801_s23 = smov (!%p26_p0, %s28_s23), %s612_s18 }
   0xa   : > { %p691_p3 = por %p121_p2, %p120_p1  ;;  %p30_p5 = scmp.ge.s32.totalorder %s801_s23, 2 }
   0xb   : > { %p127_p6 = scmp.eq.s32.totalorder %s416_s21, 7  ;;  %p419_p7 = scmp.ge.s32.totalorder %s616_s19, 1 }
   0xc   : > { %p167_p8 = scmp.lt.s32.totalorder %s616_s19, 9  ;;  %s803_s23 = smov (%p30_p5, %s801_s23), 0 }
   0xd   : > { %788 = sst [smem:[#allocation6_spill]] %s803_s23  ;;  %p701_p9 = por %p127_p6, %p126_p4 }
   0xe   : > { %p168_p10 = pnand %p419_p7, %p167_p8  ;;  %s107_s26 = ssub.s32 %s612_s18, %s803_s23 }
   0xf   : > { %s110_s27 = sadd.s32 1, %s596_s14  ;;  %p108_p11 = scmp.eq.s32.totalorder %s107_s26, 0 }
  0x10   : > { %171 = sbr.rel (%p168_p10) target bundleno = 268 (0x10c), region = 32  ;;  %s196_s29 = sand.u32 (!%p168_p10), 1, %s592_s13  }
  0x11   : > { %s709_s28 = scalar_select %p108_p11, %s596_s14, %s110_s27  }
  0x12   : > { %p199_p12 = scmp.lt.s32.totalorder (!%p168_p10), %s604_s16, 1  ;;  %s715_s30 = sshll.u32 (!%p168_p10), %s196_s29, 3 }
  0x13   : > { %p201_p13 = scmp.lt.s32.totalorder (!%p168_p10), %s600_s15, 3  ;;  %s198_s23 = scalar_lea.vmem (!%p168_p10), [#allocation3], %s715_s30 }
  0x14   : > { %p425_p0 = scmp.ne.s32.totalorder (!%p168_p10), %s600_s15, 0 }
  0x15   : > { %s200_s4 = scalar_select %p199_p12, %s604_s16, 1 }
  0x16   : > { %s202_s5 = scalar_select %p201_p13, %s600_s15, 3 }
  0x17   : > { %s421_s6 = sshll.u32 %s200_s4, 2  ;;  %215 = sbr.rel (%p425_p0) target bundleno = 30 (0x1e), region = 36 }
  0x18   : > { %s204_s7 = sadd.s32 %s421_s6, %s202_s5  ;;  %s433_s8 = sshll.u32 %s202_s5, 5 }
  0x19   : > { %s422_s9 = sshll.u32 %s204_s7, 3  ;;  %s211_s20 = scalar_lea.vmem %s783_s1, %s433_s8 }
  0x1a   : > { %s206_s27 = scalar_lea.vmem %s782_s0, %s422_s9 }
  0x1c   : > { %v618_v0 = vmov 0.0  }
  0x1d   : > { %216 = vst [vmem:[#allocation2] sm:$0xff] %v618_v0 }
  0x1e PF: > { %v222_v1 = vld [vmem:[%s211_s20 + $0x18] sm:$0xff]  ;;  %v619_v2 = vmov 0.0   ;;  %v221_v3 = vld [vmem:[%s211_s20 + $0x10] sm:$0xff]  ;;  %vm620_vm0 = vmmov 0   ;;  %v220_v4 = vld [vmem:[%s211_s20 + $0x8] sm:$0xff]  ;;  %vm223_vm1 = vcmask 261120  }
  0x1f   : > { %439 = vmatprep.subr.mxu0 %v619_v2  ;;  %447 = vmatprep.mubr.msk.f32.mxu0 %vm620_vm0, %v619_v2  ;;  %v219_v5 = vld [vmem:[%s211_s20] sm:$0xff]  ;;  %p427_p1 = scmp.ne.s32.totalorder %s600_s15, 3 }
  0x20   : > { %440 = vmatpush3.msra.mxu0 %v222_v1  ;;  %v218_v6 = vld [vmem:[%s206_s27] sm:$0xff] }
  0x21   : > { %441 = vmatprep.subr.mxu0 %v619_v2 }
  0x22   : > { %442 = vmatpush3.msra.mxu0 %v221_v3 }
  0x23   : > { %443 = vmatprep.subr.mxu0 %v619_v2 }
  0x24   : > { %444 = vmatpush3.msra.mxu0 %v220_v4  ;;  %v217_v7 = vld [vmem:[#allocation2] sm:$0xff] }
  0x25   : > { %445 = vmatprep.subr.mxu0 %v619_v2 }
  0x26   : > { %446 = vmatpush3.msra.mxu0 %v219_v5 }
  0x27   : > { %448 = vmatmul.mubr.msk.f32.vlgmr.msra.gmra.mxu0 %vm223_vm1, %v218_v6 }
  0xe6   : > { %302 = sbr.rel (%p427_p1) target bundleno = 245 (0xf5), region = 40 }
  0xe7   : > { %v293_v8 = vpop.f32.mrf.mxu0 }
  0xe8   : > { %v297_v9 = vadd.f32 %v293_v8, %v217_v7 }
  0xe9   : > { %v449_v10 = vpop.f32.mrf.mxu0 }
  0xea   : > { %298 = vst [vmem:[#allocation2] sm:$0xff] %v297_v9 }
  0xeb   : > { %v428_v12 = vld [vmem:[%s784_s2] ss:$0 sm:$0xff] }
  0xf1   : > { %v303_v11 = vld [vmem:[#allocation2] sm:$0xff] }
  0xf2   : > { %v311_v13 = vadd.f32 %v428_v12, %v303_v11 }
  0xf4   : > { %312 = vst [vmem:[%s198_s23] sm:$0xff] %v311_v13 }
  0xf5 PF: > { %s430_s6 = sshll.u32 %s604_s16, 7  ;;  %s327_s9 = sshll.u32 %s198_s23, 4  ;;  %s328_s9 = int_to_ptr.vmem [resolvable:$true] %s327_s9 }
  0xf6   : > { %s325_s15 = scalar_lea.hbm %s785_s3, %s430_s6  ;;  %s314_s10 = scalar_lea.sflag [#allocation4], %s196_s29 }
  0xf7   : > { %s524_s11 = scalar_lea.vmem %s328_s9, 128  ;;  %s621_s20 = smov [#allocation3]  }
  0xf8   : > { %p525_p2 = scmp.ne.s32.totalorder %s328_s9, %s524_s11  ;;  %s528_s21 = sshll.u32 %s621_s20, 4  ;;  %s529_s21 = int_to_ptr.vmem [resolvable:$false] %s528_s21 }
  0xf9   : > { %s530_s26 = scalar_lea.vmem %s529_s21, 256  ;;  %p531_p6 = scmp.lt.s32.totalorder %s328_s9, %s529_s21 }
  0xfa   : > { %p526_p4 = pnand %p525_p2, %p691_p3  ;;  %p532_p7 = scmp.lt.s32.totalorder %s530_s26, %s524_s11 }
  0xfc   : > { %p527_p5 = pneg %p526_p4  ;;  %p533_p8 = por %p532_p7, %p531_p6 }
  0xfe   : > { %p534_p10 = pnand %p533_p8, %p527_p5 }
 0x100   : > { %537 = shalt.err (!%p534_p10)
}
 0x101   : > { %s538_s16 = scalar_lea.hbm %s325_s15, 128  ;;  %s542_s30 = scalar_lea.hbm %s785_s3, 256 }
 0x102   : > { %p539_p11 = scmp.ne.s32.totalorder %s325_s15, %s538_s16  ;;  %p543_p0 = scmp.lt.s32.totalorder %s325_s15, %s785_s3 }
 0x103   : > { %p544_p1 = scmp.lt.s32.totalorder %s542_s30, %s538_s16 }
 0x104   : > { %p540_p12 = pnand %p539_p11, %p691_p3 }
 0x105   : > { %p545_p2 = por %p544_p1, %p543_p0 }
 0x106   : > { %p541_p13 = pneg %p540_p12 }
 0x108   : > { %p546_p4 = pnand %p545_p2, %p541_p13 }
 0x10a   : > { %549 = shalt.err (!%p546_p4)
}
 0x10b   : > { %450 = dma.vmem_to_hbm [thread:$0]  (%p691_p3), %s328_s9, 128, %s325_s15, %s314_s10  }
 0x10c PF: > { %p456_p5 = scmp.ge.s32.totalorder %s616_s19, 2  ;;  %s339_s5 = sand.u32 1, %s588_s12  }
 0x10d   : > { %s340_s6 = scalar_lea.sflag [#allocation4], %s339_s5 }
 0x10e   : > { %p453_p6 = pnand %p456_p5, %p701_p9 }
 0x110   : > { %p454_p7 = pneg %p453_p6 }
 0x112   : > { %583 = dma.done.wait (%p454_p7), %s340_s6, 128  }
 0x113   : > { %585 = vsyncadd (%p454_p7), %s340_s6, 4294967168  ;;  %s16_s19 = sadd.s32 1, %s616_s19   ;;  %s790_s24 = sld [smem:[#allocation6_spill]] }
 0x114   : > { %p13_p8 = scmp.ge.s32.totalorder %s16_s19, 10   ;;  %s791_s12 = smov %s592_s13 }
 0x115   : > { %s792_s13 = smov %s596_s14  ;;  %s793_s14 = smov %s709_s28 }
 0x116   : > { %s794_s15 = smov %s608_s17  ;;  %s795_s16 = smov %s612_s18 }
 0x117   : > { %s796_s17 = smov %s799_s22  ;;  %15 = sbr.rel (!%p13_p8) target bundleno = 5 (0x5), region = 78 }
 0x119   : > { %s797_s18 = smov %s790_s24 }
 0x11c   :  { %345 = vsyncpa [#allocation4], 1 }
 0x11d   :  { %347 = vsyncpa [#allocation4 + $0x1], 1 }

</bundles_post_ra>
